<compile_context>
chip_gen: v7x
topology: tpu7x:2x2x1
jax: 0.10.0
libtpu: 0.0.40
codegen_flags: <defaults>
</compile_context>

<pallas_src>
import functools

import jax
import jax.numpy as jnp
from jax.experimental import pallas as pl
from jax.experimental.pallas import tpu as pltpu

LANE = 128     # pad channel dims to lane width
SUBLANE = 8    # pad node counts to sublane width


def _round_up(n, m):
    return ((n + m - 1) // m) * m


def _pad2(x, rows, cols):
    r, c = x.shape
    return jnp.pad(x, ((0, rows - r), (0, cols - c)))


def _vmem_spec():
    return pl.BlockSpec(memory_space=pltpu.MemorySpace.VMEM)


# ----------------------------- Pallas kernel ------------------------------

def _rgcn_fused_kernel(*refs, num_layers, num_blocks, num_classes):
    """Fused RGCN forward: all conv layers + ReLU + final log_softmax.

    refs = (x0, [adj_l, w_l, bias_l] * num_layers, out)
      x0     (P0_pad, C0_pad)              f32  padded input features
      adj_l  ((R+NT)*T_pad, S_pad)         bf16 stacked [mean-norm adjacency per
                                                edge type | diagonal target-type
                                                masks]
      w_l    (R+NT, Cin_pad, Cout_pad)     bf16 stacked [w_rel | w_root]
      bias_l (T_pad, Cout_pad)             f32  per-node root bias (onehot @ b)
      out    (T_last_pad, Cout_last_pad)   f32
    """
    x_ref = refs[0]
    out_ref = refs[-1]
    layer_refs = refs[1:1 + 3 * num_layers]

    x = x_ref[...]                        # f32, zero in padded rows/lanes
    for layer in range(num_layers):
        adj_ref = layer_refs[3 * layer + 0]
        w_ref = layer_refs[3 * layer + 1]
        bias_ref = layer_refs[3 * layer + 2]
        t_pad = adj_ref.shape[0] // num_blocks

        # One big aggregation matmul: relation aggregates (mean folded into the
        # adjacency) AND type-masked root features come out as row blocks.
        agg = jnp.dot(adj_ref[...], x.astype(jnp.bfloat16),
                      preferred_element_type=jnp.float32)   # ((R+NT)*T_pad, Cin_pad)

        # Projection: accumulating block matmuls over sublane-aligned views of
        # agg (no lane concat / no f32 feats materialization).
        out = bias_ref[...]
        for b in range(num_blocks):
            blk = agg[b * t_pad:(b + 1) * t_pad].astype(jnp.bfloat16)
            out = out + jnp.dot(blk, w_ref[b],
                                preferred_element_type=jnp.float32)

        if layer != num_layers - 1:
            out = jnp.maximum(out, 0.0)
            # TODO(synk): F.dropout(p=0.5, training=True) omitted — this is the
            # eval-mode (identity) forward.
        x = out

    # Fused log_softmax over the real class lanes; exp of the -1e30-masked
    # padded lanes underflows to 0, so one select suffices.
    cols = jax.lax.broadcasted_iota(jnp.int32, x.shape, 1)
    xm = jnp.where(cols < num_classes, x, jnp.float32(-1e30))
    m = jnp.max(xm, axis=-1, keepdims=True)
    sumexp = jnp.sum(jnp.exp(xm - m), axis=-1, keepdims=True)
    out_ref[...] = (x - m) - jnp.log(sumexp)


# ------------------------------- JAX glue ---------------------------------

def group_input(x_dict, emb_dict, node_type, local_node_idx, n_id, in_channels):
    """Assemble input features per sampled node from x_dict / emb_dict."""
    nt = node_type[n_id]
    lidx = local_node_idx[n_id]
    h = jnp.zeros((n_id.shape[0], in_channels), jnp.float32)
    for key, x in x_dict.items():
        mask = nt == key
        idx = jnp.minimum(lidx, x.shape[0] - 1)      # explicit clamp; masked out
        h = jnp.where(mask[:, None], x[idx], h)
    for key, emb in emb_dict.items():
        mask = nt == int(key)
        idx = jnp.minimum(lidx, emb.shape[0] - 1)
        h = jnp.where(mask[:, None], emb[idx], h)
    return h


def build_norm_adj(edge_index, edge_types, n_tgt, n_src, num_edge_types):
    """Dense per-edge-type adjacency with scatter-mean normalization baked in."""
    src, tgt = edge_index[0], edge_index[1]
    adj = jnp.zeros((num_edge_types, n_tgt, n_src), jnp.float32)
    adj = adj.at[edge_types, tgt, src].add(1.0)
    deg = jnp.sum(adj, axis=-1, keepdims=True)
    return adj / jnp.maximum(deg, 1.0)               # zero in-degree -> zeros


def rgcn_forward(n_id, x_dict, emb_dict, adjs, edge_type, node_type,
                 local_node_idx, params, *, in_channels, num_node_types,
                 num_edge_types, num_layers):
    num_blocks = num_edge_types + num_node_types

    x = group_input(x_dict, emb_dict, node_type, local_node_idx, n_id,
                    in_channels)
    nt = node_type[n_id]

    p0 = _round_up(n_id.shape[0], SUBLANE)
    c0_pad = _round_up(in_channels, LANE)
    call_inputs = [_pad2(x, p0, c0_pad)]

    prev_rows = n_id.shape[0]
    total_flops = 0
    n_tgt_last = t_pad_last = c_out_last = co_pad_last = None
    for i, (edge_index, e_id, size) in enumerate(adjs):
        n_src, n_tgt = size
        # Sampler convention: layer-l source set == carried node set, and the
        # targets are its first n_tgt rows. Fail loudly if the layout differs.
        assert n_src == prev_rows, "sampler layout mismatch: n_src != carried rows"
        assert n_tgt <= n_src, "sampler layout mismatch: n_tgt > n_src"

        w_rel, w_root, b_root = params[i]
        c_in, c_out = w_rel.shape[1], w_rel.shape[2]
        s_pad = _round_up(n_src, SUBLANE)
        t_pad = _round_up(n_tgt, SUBLANE)
        ci_pad = _round_up(c_in, LANE)
        co_pad = _round_up(c_out, LANE)

        # bf16 adjacency: mean weights 1/deg quantize at ~0.4% rel error —
        # acceptable for GNN accuracy (validated vs f32 at these sizes).
        adj = build_norm_adj(edge_index, edge_type[e_id], n_tgt, n_src,
                             num_edge_types)
        onehot_t = jax.nn.one_hot(nt[:n_tgt], num_node_types, dtype=jnp.float32)
        eye = jnp.eye(n_tgt, n_src, dtype=jnp.float32)
        type_blocks = onehot_t.T[:, :, None] * eye[None]   # (NT, n_tgt, n_src)
        adj_all = jnp.concatenate([adj, type_blocks], axis=0)
        adj_all = jnp.pad(adj_all, ((0, 0), (0, t_pad - n_tgt),
                                    (0, s_pad - n_src)))
        adj_all = adj_all.reshape(num_blocks * t_pad, s_pad).astype(jnp.bfloat16)

        w_all = jnp.concatenate([w_rel, w_root], axis=0)    # (R+NT, c_in, c_out)
        w_all = jnp.pad(w_all, ((0, 0), (0, ci_pad - c_in),
                                (0, co_pad - c_out))).astype(jnp.bfloat16)

        bias = jnp.dot(onehot_t, b_root)                    # (n_tgt, c_out)
        bias_p = _pad2(bias, t_pad, co_pad)

        call_inputs += [adj_all, w_all, bias_p]
        total_flops += 2 * num_blocks * t_pad * s_pad * ci_pad      # aggregation
        total_flops += 2 * num_blocks * t_pad * ci_pad * co_pad     # projection
        prev_rows = n_tgt
        n_tgt_last, t_pad_last = n_tgt, t_pad
        c_out_last, co_pad_last = c_out, co_pad

    out_bytes = t_pad_last * co_pad_last * 4
    in_bytes = sum(int(a.size) * a.dtype.itemsize for a in call_inputs)
    cost = pl.CostEstimate(flops=int(total_flops),
                           transcendentals=int(t_pad_last * co_pad_last),
                           bytes_accessed=int(in_bytes + out_bytes))
    # Explicit scoped-VMEM budget (default 16/32 MiB limits bite long before
    # physical VMEM); clamp to stay inside v7x's 64 MiB part.
    vmem_limit = int(min(48 << 20, max(8 << 20, 4 * (in_bytes + out_bytes))))

    kernel = functools.partial(_rgcn_fused_kernel,
                               num_layers=num_layers,
                               num_blocks=num_blocks,
                               num_classes=c_out_last)
    out_p = pl.pallas_call(
        kernel,
        out_shape=jax.ShapeDtypeStruct((t_pad_last, co_pad_last), jnp.float32),
        in_specs=[_vmem_spec() for _ in call_inputs],
        out_specs=_vmem_spec(),
        compiler_params=pltpu.CompilerParams(vmem_limit_bytes=vmem_limit),
        cost_estimate=cost,
    )(*call_inputs)
    return out_p[:n_tgt_last, :c_out_last]


def glorot(key, shape):
    fan_in, fan_out = shape[-2], shape[-1]
    limit = (6.0 / (fan_in + fan_out)) ** 0.5
    return jax.random.uniform(key, shape, jnp.float32, -limit, limit)


# --------------------------------- main ------------------------------------

if __name__ == "__main__":
    key = jax.random.PRNGKey(0)
    ks = jax.random.split(key, 18)

    I, H, O = 32, 64, 16            # in / hidden / out channels
    num_layers = 2
    num_node_types = 3
    num_edge_types = 3
    num_nodes_dict = {0: 100, 1: 80, 2: 60}   # type 0 has raw features
    total_nodes = sum(num_nodes_dict.values())

    # group_hetero_graph-style global node bookkeeping.
    node_type = jnp.concatenate(
        [jnp.full((n,), t, jnp.int32) for t, n in num_nodes_dict.items()])
    local_node_idx = jnp.concatenate(
        [jnp.arange(n, dtype=jnp.int32) for n in num_nodes_dict.values()])

    # Raw features (x_types = {0}) and learned embeddings for types 1, 2.
    x_dict = {0: jax.random.normal(ks[0], (num_nodes_dict[0], I), jnp.float32)}
    emb_dict = {'1': glorot(ks[1], (num_nodes_dict[1], I)),
                '2': glorot(ks[2], (num_nodes_dict[2], I))}

    # Deterministic parameters for the two RGCNConv layers (stored as x @ W).
    params = []
    kidx = 3
    for cin, cout in [(I, H), (H, O)]:
        w_rel = glorot(ks[kidx], (num_edge_types, cin, cout)); kidx += 1
        w_root = glorot(ks[kidx], (num_node_types, cin, cout)); kidx += 1
        b_root = 0.01 * jax.random.normal(ks[kidx], (num_node_types, cout),
                                          jnp.float32); kidx += 1
        params.append((w_rel, w_root, b_root))

    # Synthetic NeighborSampler output: node set shrinks per layer,
    # size = (n_src, n_tgt), targets are the first n_tgt source nodes.
    N0, N1, N2 = 64, 32, 16
    n_id = jax.random.permutation(ks[10], total_nodes)[:N0].astype(jnp.int32)

    E0, E1 = 128, 64
    ei0 = jnp.stack([jax.random.randint(ks[11], (E0,), 0, N0),
                     jax.random.randint(ks[12], (E0,), 0, N1)]).astype(jnp.int32)
    ei1 = jnp.stack([jax.random.randint(ks[13], (E1,), 0, N1),
                     jax.random.randint(ks[14], (E1,), 0, N2)]).astype(jnp.int32)
    edge_type = jax.random.randint(ks[15], (E0 + E1,), 0,
                                   num_edge_types).astype(jnp.int32)
    e_id0 = jnp.arange(E0, dtype=jnp.int32)
    e_id1 = jnp.arange(E0, E0 + E1, dtype=jnp.int32)
    adjs = [(ei0, e_id0, (N0, N1)),
            (ei1, e_id1, (N1, N2))]

    out = rgcn_forward(n_id, x_dict, emb_dict, adjs, edge_type, node_type,
                       local_node_idx, params,
                       in_channels=I, num_node_types=num_node_types,
                       num_edge_types=num_edge_types, num_layers=num_layers)
    out = jax.block_until_ready(out)
    assert out.shape == (N2, O)
    assert bool(jnp.all(jnp.isfinite(out)))
    print("KERNEL_OK")
</pallas_src>

<mosaic_0001>
module attributes {stable_mosaic.version = 11 : i64} {
  func.func @_rgcn_fused_kernel(%arg0: memref<64x128xf32, #tpu.memory_space<vmem>>, %arg1: memref<192x64xbf16, #tpu.memory_space<vmem>>, %arg2: memref<6x128x128xbf16, #tpu.memory_space<vmem>>, %arg3: memref<32x128xf32, #tpu.memory_space<vmem>>, %arg4: memref<96x32xbf16, #tpu.memory_space<vmem>>, %arg5: memref<6x128x128xbf16, #tpu.memory_space<vmem>>, %arg6: memref<16x128xf32, #tpu.memory_space<vmem>>, %arg7: memref<16x128xf32, #tpu.memory_space<vmem>>) attributes {dimension_semantics = [], scalar_prefetch = 0 : i64, scratch_operands = 0 : i64, tpu.core_type = #tpu.core_type<tc>} {
    %c0 = arith.constant 0 : index
    %c0_0 = arith.constant 0 : index
    %0 = vector.load %arg0[%c0, %c0_0] : memref<64x128xf32, #tpu.memory_space<vmem>>, vector<64x128xf32>
    %c0_1 = arith.constant 0 : index
    %c0_2 = arith.constant 0 : index
    %1 = vector.load %arg1[%c0_1, %c0_2] : memref<192x64xbf16, #tpu.memory_space<vmem>>, vector<192x64xbf16>
    %2 = arith.truncf %0 : vector<64x128xf32> to vector<64x128xbf16>
    %cst = arith.constant dense<0.000000e+00> : vector<192x128xf32>
    %3 = tpu.matmul %1, %2, %cst {dimension_numbers = #tpu.dot_dimension_numbers<[1], [0], [0], [1], [0, 0, 1, 1], [], []>} : vector<192x64xbf16>, vector<64x128xbf16>, vector<192x128xf32> -> vector<192x128xf32>
    %c0_3 = arith.constant 0 : index
    %c0_4 = arith.constant 0 : index
    %4 = vector.load %arg3[%c0_3, %c0_4] : memref<32x128xf32, #tpu.memory_space<vmem>>, vector<32x128xf32>
    %5 = vector.extract_strided_slice %3 {offsets = [0, 0], sizes = [32, 128], strides = [1, 1]} : vector<192x128xf32> to vector<32x128xf32>
    %6 = arith.truncf %5 : vector<32x128xf32> to vector<32x128xbf16>
    %c0_5 = arith.constant 0 : index
    %c0_6 = arith.constant 0 : index
    %c0_7 = arith.constant 0 : index
    %7 = vector.load %arg2[%c0_5, %c0_6, %c0_7] : memref<6x128x128xbf16, #tpu.memory_space<vmem>>, vector<1x128x128xbf16>
    %8 = vector.shape_cast %7 : vector<1x128x128xbf16> to vector<128x128xbf16>
    %cst_8 = arith.constant dense<0.000000e+00> : vector<32x128xf32>
    %9 = tpu.matmul %6, %8, %cst_8 {dimension_numbers = #tpu.dot_dimension_numbers<[1], [0], [0], [1], [0, 0, 1, 1], [], []>} : vector<32x128xbf16>, vector<128x128xbf16>, vector<32x128xf32> -> vector<32x128xf32>
    %10 = arith.addf %4, %9 : vector<32x128xf32>
    %11 = vector.extract_strided_slice %3 {offsets = [32, 0], sizes = [32, 128], strides = [1, 1]} : vector<192x128xf32> to vector<32x128xf32>
    %12 = arith.truncf %11 : vector<32x128xf32> to vector<32x128xbf16>
    %c1 = arith.constant 1 : index
    %c0_9 = arith.constant 0 : index
    %c0_10 = arith.constant 0 : index
    %13 = vector.load %arg2[%c1, %c0_9, %c0_10] : memref<6x128x128xbf16, #tpu.memory_space<vmem>>, vector<1x128x128xbf16>
    %14 = vector.shape_cast %13 : vector<1x128x128xbf16> to vector<128x128xbf16>
    %cst_11 = arith.constant dense<0.000000e+00> : vector<32x128xf32>
    %15 = tpu.matmul %12, %14, %cst_11 {dimension_numbers = #tpu.dot_dimension_numbers<[1], [0], [0], [1], [0, 0, 1, 1], [], []>} : vector<32x128xbf16>, vector<128x128xbf16>, vector<32x128xf32> -> vector<32x128xf32>
    %16 = arith.addf %10, %15 : vector<32x128xf32>
    %17 = vector.extract_strided_slice %3 {offsets = [64, 0], sizes = [32, 128], strides = [1, 1]} : vector<192x128xf32> to vector<32x128xf32>
    %18 = arith.truncf %17 : vector<32x128xf32> to vector<32x128xbf16>
    %c2 = arith.constant 2 : index
    %c0_12 = arith.constant 0 : index
    %c0_13 = arith.constant 0 : index
    %19 = vector.load %arg2[%c2, %c0_12, %c0_13] : memref<6x128x128xbf16, #tpu.memory_space<vmem>>, vector<1x128x128xbf16>
    %20 = vector.shape_cast %19 : vector<1x128x128xbf16> to vector<128x128xbf16>
    %cst_14 = arith.constant dense<0.000000e+00> : vector<32x128xf32>
    %21 = tpu.matmul %18, %20, %cst_14 {dimension_numbers = #tpu.dot_dimension_numbers<[1], [0], [0], [1], [0, 0, 1, 1], [], []>} : vector<32x128xbf16>, vector<128x128xbf16>, vector<32x128xf32> -> vector<32x128xf32>
    %22 = arith.addf %16, %21 : vector<32x128xf32>
    %23 = vector.extract_strided_slice %3 {offsets = [96, 0], sizes = [32, 128], strides = [1, 1]} : vector<192x128xf32> to vector<32x128xf32>
    %24 = arith.truncf %23 : vector<32x128xf32> to vector<32x128xbf16>
    %c3 = arith.constant 3 : index
    %c0_15 = arith.constant 0 : index
    %c0_16 = arith.constant 0 : index
    %25 = vector.load %arg2[%c3, %c0_15, %c0_16] : memref<6x128x128xbf16, #tpu.memory_space<vmem>>, vector<1x128x128xbf16>
    %26 = vector.shape_cast %25 : vector<1x128x128xbf16> to vector<128x128xbf16>
    %cst_17 = arith.constant dense<0.000000e+00> : vector<32x128xf32>
    %27 = tpu.matmul %24, %26, %cst_17 {dimension_numbers = #tpu.dot_dimension_numbers<[1], [0], [0], [1], [0, 0, 1, 1], [], []>} : vector<32x128xbf16>, vector<128x128xbf16>, vector<32x128xf32> -> vector<32x128xf32>
    %28 = arith.addf %22, %27 : vector<32x128xf32>
    %29 = vector.extract_strided_slice %3 {offsets = [128, 0], sizes = [32, 128], strides = [1, 1]} : vector<192x128xf32> to vector<32x128xf32>
    %30 = arith.truncf %29 : vector<32x128xf32> to vector<32x128xbf16>
    %c4 = arith.constant 4 : index
    %c0_18 = arith.constant 0 : index
    %c0_19 = arith.constant 0 : index
    %31 = vector.load %arg2[%c4, %c0_18, %c0_19] : memref<6x128x128xbf16, #tpu.memory_space<vmem>>, vector<1x128x128xbf16>
    %32 = vector.shape_cast %31 : vector<1x128x128xbf16> to vector<128x128xbf16>
    %cst_20 = arith.constant dense<0.000000e+00> : vector<32x128xf32>
    %33 = tpu.matmul %30, %32, %cst_20 {dimension_numbers = #tpu.dot_dimension_numbers<[1], [0], [0], [1], [0, 0, 1, 1], [], []>} : vector<32x128xbf16>, vector<128x128xbf16>, vector<32x128xf32> -> vector<32x128xf32>
    %34 = arith.addf %28, %33 : vector<32x128xf32>
    %35 = vector.extract_strided_slice %3 {offsets = [160, 0], sizes = [32, 128], strides = [1, 1]} : vector<192x128xf32> to vector<32x128xf32>
    %36 = arith.truncf %35 : vector<32x128xf32> to vector<32x128xbf16>
    %c5 = arith.constant 5 : index
    %c0_21 = arith.constant 0 : index
    %c0_22 = arith.constant 0 : index
    %37 = vector.load %arg2[%c5, %c0_21, %c0_22] : memref<6x128x128xbf16, #tpu.memory_space<vmem>>, vector<1x128x128xbf16>
    %38 = vector.shape_cast %37 : vector<1x128x128xbf16> to vector<128x128xbf16>
    %cst_23 = arith.constant dense<0.000000e+00> : vector<32x128xf32>
    %39 = tpu.matmul %36, %38, %cst_23 {dimension_numbers = #tpu.dot_dimension_numbers<[1], [0], [0], [1], [0, 0, 1, 1], [], []>} : vector<32x128xbf16>, vector<128x128xbf16>, vector<32x128xf32> -> vector<32x128xf32>
    %40 = arith.addf %34, %39 : vector<32x128xf32>
    %cst_24 = arith.constant 0.000000e+00 : f32
    %41 = vector.broadcast %cst_24 : f32 to vector<32x128xf32>
    %42 = arith.maximumf %40, %41 : vector<32x128xf32>
    %c0_25 = arith.constant 0 : index
    %c0_26 = arith.constant 0 : index
    %43 = vector.load %arg4[%c0_25, %c0_26] : memref<96x32xbf16, #tpu.memory_space<vmem>>, vector<96x32xbf16>
    %44 = arith.truncf %42 : vector<32x128xf32> to vector<32x128xbf16>
    %cst_27 = arith.constant dense<0.000000e+00> : vector<96x128xf32>
    %45 = tpu.matmul %43, %44, %cst_27 {dimension_numbers = #tpu.dot_dimension_numbers<[1], [0], [0], [1], [0, 0, 1, 1], [], []>} : vector<96x32xbf16>, vector<32x128xbf16>, vector<96x128xf32> -> vector<96x128xf32>
    %c0_28 = arith.constant 0 : index
    %c0_29 = arith.constant 0 : index
    %46 = vector.load %arg6[%c0_28, %c0_29] : memref<16x128xf32, #tpu.memory_space<vmem>>, vector<16x128xf32>
    %47 = vector.extract_strided_slice %45 {offsets = [0, 0], sizes = [16, 128], strides = [1, 1]} : vector<96x128xf32> to vector<16x128xf32>
    %48 = arith.truncf %47 : vector<16x128xf32> to vector<16x128xbf16>
    %c0_30 = arith.constant 0 : index
    %c0_31 = arith.constant 0 : index
    %c0_32 = arith.constant 0 : index
    %49 = vector.load %arg5[%c0_30, %c0_31, %c0_32] : memref<6x128x128xbf16, #tpu.memory_space<vmem>>, vector<1x128x128xbf16>
    %50 = vector.shape_cast %49 : vector<1x128x128xbf16> to vector<128x128xbf16>
    %cst_33 = arith.constant dense<0.000000e+00> : vector<16x128xf32>
    %51 = tpu.matmul %48, %50, %cst_33 {dimension_numbers = #tpu.dot_dimension_numbers<[1], [0], [0], [1], [0, 0, 1, 1], [], []>} : vector<16x128xbf16>, vector<128x128xbf16>, vector<16x128xf32> -> vector<16x128xf32>
    %52 = arith.addf %46, %51 : vector<16x128xf32>
    %53 = vector.extract_strided_slice %45 {offsets = [16, 0], sizes = [16, 128], strides = [1, 1]} : vector<96x128xf32> to vector<16x128xf32>
    %54 = arith.truncf %53 : vector<16x128xf32> to vector<16x128xbf16>
    %c1_34 = arith.constant 1 : index
    %c0_35 = arith.constant 0 : index
    %c0_36 = arith.constant 0 : index
    %55 = vector.load %arg5[%c1_34, %c0_35, %c0_36] : memref<6x128x128xbf16, #tpu.memory_space<vmem>>, vector<1x128x128xbf16>
    %56 = vector.shape_cast %55 : vector<1x128x128xbf16> to vector<128x128xbf16>
    %cst_37 = arith.constant dense<0.000000e+00> : vector<16x128xf32>
    %57 = tpu.matmul %54, %56, %cst_37 {dimension_numbers = #tpu.dot_dimension_numbers<[1], [0], [0], [1], [0, 0, 1, 1], [], []>} : vector<16x128xbf16>, vector<128x128xbf16>, vector<16x128xf32> -> vector<16x128xf32>
    %58 = arith.addf %52, %57 : vector<16x128xf32>
    %59 = vector.extract_strided_slice %45 {offsets = [32, 0], sizes = [16, 128], strides = [1, 1]} : vector<96x128xf32> to vector<16x128xf32>
    %60 = arith.truncf %59 : vector<16x128xf32> to vector<16x128xbf16>
    %c2_38 = arith.constant 2 : index
    %c0_39 = arith.constant 0 : index
    %c0_40 = arith.constant 0 : index
    %61 = vector.load %arg5[%c2_38, %c0_39, %c0_40] : memref<6x128x128xbf16, #tpu.memory_space<vmem>>, vector<1x128x128xbf16>
    %62 = vector.shape_cast %61 : vector<1x128x128xbf16> to vector<128x128xbf16>
    %cst_41 = arith.constant dense<0.000000e+00> : vector<16x128xf32>
    %63 = tpu.matmul %60, %62, %cst_41 {dimension_numbers = #tpu.dot_dimension_numbers<[1], [0], [0], [1], [0, 0, 1, 1], [], []>} : vector<16x128xbf16>, vector<128x128xbf16>, vector<16x128xf32> -> vector<16x128xf32>
    %64 = arith.addf %58, %63 : vector<16x128xf32>
    %65 = vector.extract_strided_slice %45 {offsets = [48, 0], sizes = [16, 128], strides = [1, 1]} : vector<96x128xf32> to vector<16x128xf32>
    %66 = arith.truncf %65 : vector<16x128xf32> to vector<16x128xbf16>
    %c3_42 = arith.constant 3 : index
    %c0_43 = arith.constant 0 : index
    %c0_44 = arith.constant 0 : index
    %67 = vector.load %arg5[%c3_42, %c0_43, %c0_44] : memref<6x128x128xbf16, #tpu.memory_space<vmem>>, vector<1x128x128xbf16>
    %68 = vector.shape_cast %67 : vector<1x128x128xbf16> to vector<128x128xbf16>
    %cst_45 = arith.constant dense<0.000000e+00> : vector<16x128xf32>
    %69 = tpu.matmul %66, %68, %cst_45 {dimension_numbers = #tpu.dot_dimension_numbers<[1], [0], [0], [1], [0, 0, 1, 1], [], []>} : vector<16x128xbf16>, vector<128x128xbf16>, vector<16x128xf32> -> vector<16x128xf32>
    %70 = arith.addf %64, %69 : vector<16x128xf32>
    %71 = vector.extract_strided_slice %45 {offsets = [64, 0], sizes = [16, 128], strides = [1, 1]} : vector<96x128xf32> to vector<16x128xf32>
    %72 = arith.truncf %71 : vector<16x128xf32> to vector<16x128xbf16>
    %c4_46 = arith.constant 4 : index
    %c0_47 = arith.constant 0 : index
    %c0_48 = arith.constant 0 : index
    %73 = vector.load %arg5[%c4_46, %c0_47, %c0_48] : memref<6x128x128xbf16, #tpu.memory_space<vmem>>, vector<1x128x128xbf16>
    %74 = vector.shape_cast %73 : vector<1x128x128xbf16> to vector<128x128xbf16>
    %cst_49 = arith.constant dense<0.000000e+00> : vector<16x128xf32>
    %75 = tpu.matmul %72, %74, %cst_49 {dimension_numbers = #tpu.dot_dimension_numbers<[1], [0], [0], [1], [0, 0, 1, 1], [], []>} : vector<16x128xbf16>, vector<128x128xbf16>, vector<16x128xf32> -> vector<16x128xf32>
    %76 = arith.addf %70, %75 : vector<16x128xf32>
    %77 = vector.extract_strided_slice %45 {offsets = [80, 0], sizes = [16, 128], strides = [1, 1]} : vector<96x128xf32> to vector<16x128xf32>
    %78 = arith.truncf %77 : vector<16x128xf32> to vector<16x128xbf16>
    %c5_50 = arith.constant 5 : index
    %c0_51 = arith.constant 0 : index
    %c0_52 = arith.constant 0 : index
    %79 = vector.load %arg5[%c5_50, %c0_51, %c0_52] : memref<6x128x128xbf16, #tpu.memory_space<vmem>>, vector<1x128x128xbf16>
    %80 = vector.shape_cast %79 : vector<1x128x128xbf16> to vector<128x128xbf16>
    %cst_53 = arith.constant dense<0.000000e+00> : vector<16x128xf32>
    %81 = tpu.matmul %78, %80, %cst_53 {dimension_numbers = #tpu.dot_dimension_numbers<[1], [0], [0], [1], [0, 0, 1, 1], [], []>} : vector<16x128xbf16>, vector<128x128xbf16>, vector<16x128xf32> -> vector<16x128xf32>
    %82 = arith.addf %76, %81 : vector<16x128xf32>
    %83 = tpu.iota {dimensions = array<i32: 1>} : vector<16x128xi32>
    %c16_i32 = arith.constant 16 : i32
    %84 = vector.broadcast %c16_i32 : i32 to vector<16x128xi32>
    %85 = arith.cmpi slt, %83, %84 : vector<16x128xi32>
    %cst_54 = arith.constant -1.000000e+30 : f32
    %86 = vector.broadcast %cst_54 : f32 to vector<16x128xf32>
    %87 = arith.select %85, %82, %86 : vector<16x128xi1>, vector<16x128xf32>
    %cst_55 = arith.constant dense<0xFF800000> : vector<16xf32>
    %88 = vector.multi_reduction <maximumf>, %87, %cst_55 [1] : vector<16x128xf32> to vector<16xf32>
    %89 = vector.shape_cast %88 : vector<16xf32> to vector<16x1xf32>
    %90 = vector.broadcast %89 : vector<16x1xf32> to vector<16x128xf32>
    %91 = arith.subf %87, %90 : vector<16x128xf32>
    %92 = math.exp %91 : vector<16x128xf32>
    %cst_56 = arith.constant dense<0.000000e+00> : vector<16xf32>
    %93 = vector.multi_reduction <add>, %92, %cst_56 [1] : vector<16x128xf32> to vector<16xf32>
    %94 = vector.shape_cast %93 : vector<16xf32> to vector<16x1xf32>
    %95 = vector.broadcast %89 : vector<16x1xf32> to vector<16x128xf32>
    %96 = arith.subf %82, %95 : vector<16x128xf32>
    %97 = math.log %94 : vector<16x1xf32>
    %98 = vector.broadcast %97 : vector<16x1xf32> to vector<16x128xf32>
    %99 = arith.subf %96, %98 : vector<16x128xf32>
    %c0_57 = arith.constant 0 : index
    %c0_58 = arith.constant 0 : index
    %100 = vector.load %arg7[%c0_57, %c0_58] : memref<16x128xf32, #tpu.memory_space<vmem>>, vector<16x128xf32>
    tpu.vector_store %arg7[%c0_57, %c0_58], %99 {strides = array<i32>} : memref<16x128xf32, #tpu.memory_space<vmem>>, vector<16x128xf32>,
    return
  }
}

</mosaic_0001>

<bundles_post_ra>
// kernel: tpu_custom_call.1
= control target key start
LH: loop header
LB: loop body
LE: loop exit
PB: predicated region body
PF: predicated region fallthrough
CT: control target
= control target key end

     0   :  { %12 = vsyncpa [#allocation3], 0  ;;  %s3049_s0 = inlined_call_operand.vmem [shape: f32[64,128], index: 0, kind: input, shape index: {}]   ;;  %s3050_s1 = inlined_call_operand.vmem [shape: bf16[192,64], index: 1, kind: input, shape index: {}]   ;;  %s3051_s2 = inlined_call_operand.hbm [shape: bf16[6,128,128], index: 2, kind: input, shape index: {}]   ;;  %s3052_s3 = inlined_call_operand.vmem [shape: f32[32,128], index: 3, kind: input, shape index: {}]   ;;  %s3053_s4 = inlined_call_operand.vmem [shape: bf16[96,32], index: 4, kind: input, shape index: {}]   ;;  %s3054_s5 = inlined_call_operand.hbm [shape: bf16[6,128,128], index: 5, kind: input, shape index: {}]   ;;  %s3055_s6 = inlined_call_operand.vmem [shape: f32[16,128], index: 6, kind: input, shape index: {}]   ;;  %s3056_s7 = inlined_call_operand.hbm [shape: f32[16,128], index: 7, kind: output, shape index: {}]  }
   0x1   :  { %13 = vsyncpa [#allocation6], 0 }
   0x2   :  { %14 = vsyncpa [#allocation4], 0  ;;  %s2706_s24 = smov [#allocation2]   ;;  %s2634_s28 = scalar_lea.hbm %s3051_s2, 6144 }
   0x3   :  { %s24_s25 = sshll.u32 %s2706_s24, 4  ;;  %p2635_p0 = scmp.ne.s32.totalorder %s3051_s2, %s2634_s28  ;;  %s25_s25 = int_to_ptr.vmem [resolvable:$true] %s24_s25 }
   0x4   :  { %p2638_p1 = scmp.lt.u32.totalorder %s2634_s28, %s3051_s2 }
   0x6   :  { %p2640_p2 = pnand %p2638_p1, %p2635_p0 }
   0x8   :  { %2643 = shalt.err (!%p2640_p2)
}
   0x9   :  { %s2644_s10 = scalar_lea.vmem %s25_s25, 6144  ;;  %p2649_p4 = scmp.lt.s32.totalorder %s25_s25, %s25_s25 }
   0xa   :  { %p2645_p3 = scmp.ne.s32.totalorder %s25_s25, %s2644_s10  ;;  %p2650_p5 = scmp.lt.s32.totalorder %s2644_s10, %s2644_s10 }
   0xc   :  { %p2651_p6 = por %p2650_p5, %p2649_p4 }
   0xe   :  { %p2652_p7 = pnand %p2651_p6, %p2645_p3 }
  0x10   :  { %2655 = shalt.err (!%p2652_p7)
}
  0x11   :  { %s2707_s11 = smov 64   ;;  %s2708_s12 = smov 4  }
  0x12   :  { %30 = dma.hbm_to_vmem [thread:$0]  %s3051_s2, 6144, %s25_s25, [#allocation3], %s2707_s11, %s2707_s11, %s2708_s12  }
  0x13   :  { %s2709_s15 = smov [#allocation5]   ;;  %s2656_s19 = scalar_lea.hbm %s3054_s5, 6144 }
  0x14   :  { %s40_s16 = sshll.u32 %s2709_s15, 4  ;;  %p2657_p8 = scmp.ne.s32.totalorder %s3054_s5, %s2656_s19  ;;  %s41_s16 = int_to_ptr.vmem [resolvable:$true] %s40_s16 }
  0x15   :  { %p2660_p9 = scmp.lt.u32.totalorder %s2656_s19, %s3054_s5 }
  0x17   :  { %p2662_p10 = pnand %p2660_p9, %p2657_p8 }
  0x19   :  { %2665 = shalt.err (!%p2662_p10)
}
  0x1a   :  { %s2666_s24 = scalar_lea.vmem %s41_s16, 6144  ;;  %p2671_p12 = scmp.lt.s32.totalorder %s41_s16, %s41_s16 }
  0x1b   :  { %p2667_p11 = scmp.ne.s32.totalorder %s41_s16, %s2666_s24  ;;  %p2672_p13 = scmp.lt.s32.totalorder %s2666_s24, %s2666_s24 }
  0x1d   :  { %p2673_p0 = por %p2672_p13, %p2671_p12 }
  0x1f   :  { %p2674_p1 = pnand %p2673_p0, %p2667_p11 }
  0x21   :  { %2677 = shalt.err (!%p2674_p1)
}
  0x22   :  { %46 = dma.hbm_to_vmem [thread:$0]  %s3054_s5, 6144, %s41_s16, [#allocation6], %s2707_s11, %s2707_s11, %s2708_s12  }
  0x23   :  { %2700 = dma.done.wait [#allocation3], 6144  }
  0x24   :  { %2701 = vsyncadd [#allocation3], 4294961152 }
  0x25   :  { %2702 = dma.done.wait [#allocation6], 6144  }
  0x26   :  { %2703 = vsyncadd [#allocation6], 4294961152  ;;  %v56_v0 = vld [vmem:[%s3049_s0] sm:$0xff]  ;;  %v57_v1 = vld [vmem:[%s3049_s0 + $0x8] sm:$0xff]  ;;  %vm152_vm0 = vcmask 523264   ;;  %vm1089_vm1 = vcmask 261120  }
  0x27   :  { %v58_v2 = vld [vmem:[%s3049_s0 + $0x10] sm:$0xff]  ;;  %v88_v3 = vpack.c.bf16 %v57_v1, %v56_v0  ;;  %v59_v4 = vld [vmem:[%s3049_s0 + $0x18] sm:$0xff]  ;;  %v60_v6 = vld [vmem:[%s3049_s0 + $0x20] sm:$0xff]  ;;  %vm2711_vm2 = vmmov 0  }
  0x28   :  { %v89_v5 = vpack.c.bf16 %v59_v4, %v58_v2  ;;  %v61_v7 = vld [vmem:[%s3049_s0 + $0x28] sm:$0xff]  ;;  %v2512_v8 = vld [vmem:[%s3050_s1] sm:$0xff]   ;;  %v62_v9 = vld [vmem:[%s3049_s0 + $0x30] sm:$0xff] }
  0x29   :  { %2161 = vmatprep.subr.bf16.mxu0 %v88_v3  ;;  %2449 = vmatprep.subr.bf16.mxu1 %v88_v3  ;;  %v90_v10 = vpack.c.bf16 %v61_v7, %v60_v6  ;;  %v2514_v11 = vld [vmem:[%s3050_s1 + $0x10] sm:$0xff]   ;;  %v63_v12 = vld [vmem:[%s3049_s0 + $0x38] sm:$0xff]  ;;  %v2513_v14 = vld [vmem:[%s3050_s1 + $0x8] sm:$0xff]  }
  0x2a   :  { %2162 = vmatpush3.bf16.msra.mxu0 %v88_v3  ;;  %2453 = vmatpush3.bf16.msra.mxu1 %v88_v3  ;;  %v91_v13 = vpack.c.bf16 %v63_v12, %v62_v9  ;;  %v2515_v15 = vld [vmem:[%s3050_s1 + $0x18] sm:$0xff]   ;;  %v2524_v16 = vld [vmem:[#allocation2] sm:$0xff]   ;;  %v2525_v18 = vld [vmem:[#allocation2 + $0x8] sm:$0xff]  }
  0x2b   :  { %2163 = vmatprep.subr.bf16.mxu0 %v89_v5  ;;  %2169 = vmatprep.mubr.msk.bf16.mxu0 %vm152_vm0, %v2512_v8  ;;  %v2516_v17 = vld [vmem:[%s3050_s1 + $0x20] sm:$0xff]   ;;  %v2517_v19 = vld [vmem:[%s3050_s1 + $0x28] sm:$0xff]   ;;  %v2526_v20 = vld [vmem:[#allocation2 + $0x10] sm:$0xff]  }
  0x2c   :  { %2450 = vmatprep.subr.bf16.mxu1 %v89_v5  ;;  %2173 = vmatprep.mubr.msk.bf16.mxu1 %vm152_vm0, %v2514_v11  ;;  %v2518_v21 = vld [vmem:[%s3050_s1 + $0x30] sm:$0xff]   ;;  %v2527_v22 = vld [vmem:[#allocation2 + $0x18] sm:$0xff]   ;;  %v2528_v23 = vld [vmem:[#allocation2 + $0x20] sm:$0xff]  }
  0x2d   :  { %v2519_v24 = vld [vmem:[%s3050_s1 + $0x38] sm:$0xff]   ;;  %v2520_v25 = vld [vmem:[%s3050_s1 + $0x40] sm:$0xff]   ;;  %v2529_v26 = vld [vmem:[#allocation2 + $0x28] sm:$0xff]  }
  0x2e   :  { %2164 = vmatpush3.bf16.msra.mxu0 %v89_v5  ;;  %2454 = vmatpush3.bf16.msra.mxu1 %v89_v5  ;;  %v2530_v27 = vld [vmem:[#allocation2 + $0x30] sm:$0xff]   ;;  %v2521_v28 = vld [vmem:[%s3050_s1 + $0x48] sm:$0xff]   ;;  %v2523_v30 = vld [vmem:[%s3050_s1 + $0x58] sm:$0xff]  }
  0x2f   :  { %2165 = vmatprep.subr.bf16.mxu0 %v90_v10  ;;  %2451 = vmatprep.subr.bf16.mxu1 %v90_v10  ;;  %v2522_v29 = vld [vmem:[%s3050_s1 + $0x50] sm:$0xff]   ;;  %v2531_v31 = vld [vmem:[#allocation2 + $0x38] sm:$0xff]   ;;  %v2532_v32 = vld [vmem:[#allocation2 + $0x40] sm:$0xff]  }
  0x30   :  { %v2533_v45 = vld [vmem:[#allocation2 + $0x48] sm:$0xff]   ;;  %v2534_v47 = vld [vmem:[#allocation2 + $0x50] sm:$0xff]   ;;  %v2535_v53 = vld [vmem:[#allocation2 + $0x58] sm:$0xff]  }
  0x31   :  { %v2536_v55 = vld [vmem:[#allocation2 + $0x60] sm:$0xff]   ;;  %v2537_v61 = vld [vmem:[#allocation2 + $0x68] sm:$0xff]   ;;  %v2538_v63 = vld [vmem:[#allocation2 + $0x70] sm:$0xff]  }
  0x32   :  { %2166 = vmatpush3.bf16.msra.mxu0 %v90_v10  ;;  %2455 = vmatpush3.bf16.msra.mxu1 %v90_v10  ;;  %v2539_v5 = vld [vmem:[#allocation2 + $0x78] sm:$0xff]   ;;  %v2540_v7 = vld [vmem:[#allocation2 + $0x80] sm:$0xff]  }
  0x33   :  { %2167 = vmatprep.subr.bf16.mxu0 %v91_v13  ;;  %2452 = vmatprep.subr.bf16.mxu1 %v91_v13 }
  0x36   :  { %2168 = vmatpush3.bf16.msra.mxu0 %v91_v13  ;;  %2456 = vmatpush3.bf16.msra.mxu1 %v91_v13  ;;  %v2541_v13 = vld [vmem:[#allocation2 + $0x88] sm:$0xff]  }
  0x37   :  { %2193 = vmatprep.subr.bf16.mxu1 %v2524_v16 }
  0x39   :  { %2170 = vmatmul.mubr.msk.bf16.vlgmr.msra.gmra.mrb[0].mxu0 %vm152_vm0, %v2513_v14  ;;  %2174 = vmatmul.mubr.msk.bf16.vlgmr.msra.gmra.mrb[0].mxu1 %vm152_vm0, %v2515_v15  ;;  %v2542_v14 = vld [vmem:[#allocation2 + $0x90] sm:$0xff]   ;;  %v2543_v15 = vld [vmem:[#allocation2 + $0x98] sm:$0xff]  }
  0x3a   :  { %2177 = vmatprep.mubr.msk.bf16.mxu1 %vm152_vm0, %v2516_v17  ;;  %2194 = vmatpush3.bf16.msra.mxu1 %v2524_v16  ;;  %v2544_v16 = vld [vmem:[#allocation2 + $0xa0] sm:$0xff]   ;;  %v2545_v17 = vld [vmem:[#allocation2 + $0xa8] sm:$0xff]  }
  0x3b   :  { %2195 = vmatprep.subr.bf16.mxu1 %v2525_v18 }
  0x3e   :  { %2196 = vmatpush3.bf16.msra.mxu1 %v2525_v18  ;;  %v2546_v18 = vld [vmem:[#allocation2 + $0xb0] sm:$0xff]  }
  0x3f   :  { %2197 = vmatprep.subr.bf16.mxu1 %v2526_v20 }
  0x41   :  { %2178 = vmatmul.mubr.msk.bf16.gmra.mrb[4].mxu1 %vm152_vm0, %v2517_v19  ;;  %v2547_v19 = vld [vmem:[#allocation2 + $0xb8] sm:$0xff]  }
  0x42   :  { %2181 = vmatprep.mubr.msk.bf16.mxu1 %vm152_vm0, %v2518_v21  ;;  %2198 = vmatpush3.bf16.msra.mxu1 %v2526_v20  ;;  %v2548_v20 = vld [vmem:[#allocation2 + $0xc0] sm:$0xff]   ;;  %v2549_v21 = vld [vmem:[#allocation2 + $0xc8] sm:$0xff]  }
  0x43   :  { %2199 = vmatprep.subr.bf16.mxu1 %v2527_v22 }
  0x46   :  { %2200 = vmatpush3.bf16.msra.mxu1 %v2527_v22  ;;  %v2550_v22 = vld [vmem:[#allocation2 + $0xd0] sm:$0xff]  }
  0x47   :  { %2201 = vmatprep.subr.bf16.mxu1 %v2528_v23 }
  0x49   :  { %2182 = vmatmul.mubr.msk.bf16.gmra.mrb[8].mxu1 %vm152_vm0, %v2519_v24  ;;  %v2552_v24 = vld [vmem:[#allocation2 + $0xe0] sm:$0xff]  }
  0x4a   :  { %2185 = vmatprep.mubr.msk.bf16.mxu1 %vm152_vm0, %v2520_v25  ;;  %2202 = vmatpush3.bf16.msra.mxu1 %v2528_v23  ;;  %v2551_v23 = vld [vmem:[#allocation2 + $0xd8] sm:$0xff]   ;;  %v2553_v25 = vld [vmem:[#allocation2 + $0xe8] sm:$0xff]  }
  0x4b   :  { %2203 = vmatprep.subr.bf16.mxu1 %v2529_v26 }
  0x4e   :  { %2204 = vmatpush3.bf16.msra.mxu1 %v2529_v26  ;;  %v2554_v26 = vld [vmem:[#allocation2 + $0xf0] sm:$0xff]  }
  0x4f   :  { %2205 = vmatprep.subr.bf16.mxu1 %v2530_v27 }
  0x51   :  { %2186 = vmatmul.mubr.msk.bf16.gmra.mrb[12].mxu1 %vm152_vm0, %v2521_v28  ;;  %v2556_v28 = vld [vmem:[#allocation2 + $0x100] sm:$0xff]  }
  0x52   :  { %2189 = vmatprep.mubr.msk.bf16.mxu1 %vm152_vm0, %v2522_v29  ;;  %2206 = vmatpush3.bf16.msra.mxu1 %v2530_v27  ;;  %v2555_v27 = vld [vmem:[#allocation2 + $0xf8] sm:$0xff]   ;;  %v2557_v29 = vld [vmem:[#allocation2 + $0x108] sm:$0xff]  }
  0x53   :  { %2207 = vmatprep.subr.bf16.mxu1 %v2531_v31 }
  0x56   :  { %2208 = vmatpush3.bf16.msra.mxu1 %v2531_v31  ;;  %v2559_v31 = vld [vmem:[#allocation2 + $0x118] sm:$0xff]  }
  0x57   :  { %2213 = vmatprep.subr.bf16.mxu1 %v2532_v32 }
  0x59   :  { %2190 = vmatmul.mubr.msk.bf16.gmra.mrb[16].mxu1 %vm152_vm0, %v2523_v30  ;;  %v2558_v30 = vld [vmem:[#allocation2 + $0x110] sm:$0xff]  }
 0x10c   :  { %v2171_v33 = vpop.f32.mrb[0].mxu0  ;;  %v2851_v34 = vpop.f32.mrb[0].mxu1 }
 0x10d   :  { %v223_v35 = vpop.f32.mrb[1].mxu0  ;;  %v239_v36 = vpop.f32.mrb[1].mxu1 }
 0x10e   :  { %v2172_v37 = vpop.f32.mrb[2].mxu0  ;;  %v2176_v38 = vpop.f32.mrb[2].mxu1 }
 0x10f   :  { %v323_v39 = vpack.c.bf16 %v2172_v37, %v2171_v33  ;;  %v226_v40 = vpop.f32.mrb[3].mxu0  ;;  %v442_v41 = vpack.c.bf16 %v2176_v38, %v2851_v34  ;;  %v242_v42 = vpop.f32.mrb[3].mxu1  ;;  %v2561_v33 = vld [vmem:[#allocation2 + $0x128] sm:$0xff]   ;;  %v2562_v34 = vld [vmem:[#allocation2 + $0x130] sm:$0xff]  }
 0x110   :  { %v322_v43 = vpack.c.bf16 %v226_v40, %v223_v35  ;;  %v441_v44 = vpack.c.bf16 %v242_v42, %v239_v36  ;;  %v2563_v35 = vld [vmem:[#allocation2 + $0x138] sm:$0xff]   ;;  %v2564_v36 = vld [vmem:[#allocation2 + $0x140] sm:$0xff]   ;;  %v2565_v37 = vld [vmem:[#allocation2 + $0x148] sm:$0xff]  }
 0x111   :  { %v2566_v38 = vld [vmem:[#allocation2 + $0x150] sm:$0xff]   ;;  %v2568_v40 = vld [vmem:[#allocation2 + $0x160] sm:$0xff]  }
 0x112   :  { %2209 = vmatprep.mubr.bf16.mxu1 %v322_v43  ;;  %v2570_v42 = vld [vmem:[#allocation2 + $0x170] sm:$0xff]   ;;  %v2571_v43 = vld [vmem:[#allocation2 + $0x178] sm:$0xff]  }
 0x113   :  { %2210 = vmatmul.mubr.bf16.vlgmr.msra.gmra.mrb[20].mxu1 %v323_v39  ;;  %v2567_v39 = vld [vmem:[#allocation2 + $0x158] sm:$0xff]  }
 0x114   :  { %2214 = vmatpush3.bf16.msra.mxu1 %v2532_v32  ;;  %2229 = vmatprep.mubr.bf16.mxu1 %v441_v44  ;;  %v2854_v46 = vpop.f32.mrb[4].mxu1  ;;  %v2560_v32 = vld [vmem:[#allocation2 + $0x120] sm:$0xff]  }
 0x115   :  { %2215 = vmatprep.subr.bf16.mxu1 %v2533_v45  ;;  %v255_v48 = vpop.f32.mrb[5].mxu1  ;;  %v2572_v44 = vld [vmem:[%s3053_s4] sm:$0xff]  }
 0x116   :  { %v2856_v49 = vpop.f32.mrb[6].mxu1  ;;  %2317 = vmatprep.mubr.msk.bf16.mxu0 %vm1089_vm1, %v2572_v44  ;;  %v2599_v44 = vld [vmem:[#allocation5 + $0xa8] sm:$0xff]  }
 0x117   :  { %v562_v50 = vpack.c.bf16 %v2856_v49, %v2854_v46  ;;  %v258_v51 = vpop.f32.mrb[7].mxu1  ;;  %v318_v46 = vld [vmem:[%s3052_s3] sm:$0xff] }
 0x118   :  { %2216 = vmatpush3.bf16.msra.mxu1 %v2533_v45  ;;  %v561_v52 = vpack.c.bf16 %v258_v51, %v255_v48  ;;  %v320_v45 = vld [vmem:[%s3052_s3 + $0x10] sm:$0xff]  ;;  %v321_v48 = vld [vmem:[%s3052_s3 + $0x18] sm:$0xff]  ;;  %v319_v51 = vld [vmem:[%s3052_s3 + $0x8] sm:$0xff] }
 0x119   :  { %2217 = vmatprep.subr.bf16.mxu1 %v2534_v47 }
 0x11c   :  { %2218 = vmatpush3.bf16.msra.mxu1 %v2534_v47  ;;  %v2860_v54 = vpop.f32.mrb[8].mxu1 }
 0x11d   :  { %2219 = vmatprep.subr.bf16.mxu1 %v2535_v53  ;;  %v271_v56 = vpop.f32.mrb[9].mxu1 }
 0x11e   :  { %v2862_v57 = vpop.f32.mrb[10].mxu1 }
 0x11f   :  { %v682_v58 = vpack.c.bf16 %v2862_v57, %v2860_v54  ;;  %v274_v59 = vpop.f32.mrb[11].mxu1 }
 0x120   :  { %2220 = vmatpush3.bf16.msra.mxu1 %v2535_v53  ;;  %v681_v60 = vpack.c.bf16 %v274_v59, %v271_v56 }
 0x121   :  { %2221 = vmatprep.subr.bf16.mxu1 %v2536_v55 }
 0x124   :  { %2222 = vmatpush3.bf16.msra.mxu1 %v2536_v55  ;;  %v2866_v62 = vpop.f32.mrb[12].mxu1 }
 0x125   :  { %2223 = vmatprep.subr.bf16.mxu1 %v2537_v61  ;;  %v2868_v0 = vpop.f32.mrb[13].mxu1 }
 0x126   :  { %v2870_v1 = vpop.f32.mrb[14].mxu1 }
 0x127   :  { %v802_v2 = vpack.c.bf16 %v2870_v1, %v2866_v62  ;;  %v2874_v3 = vpop.f32.mrb[15].mxu1  ;;  %v2578_v1 = vld [vmem:[#allocation5] sm:$0xff]  }
 0x128   :  { %2224 = vmatpush3.bf16.msra.mxu1 %v2537_v61  ;;  %v801_v4 = vpack.c.bf16 %v2874_v3, %v2868_v0  ;;  %v2574_v0 = vld [vmem:[%s3053_s4 + $0x10] sm:$0xff]   ;;  %v2579_v3 = vld [vmem:[#allocation5 + $0x8] sm:$0xff]  }
 0x129   :  { %2225 = vmatprep.subr.bf16.mxu1 %v2538_v63 }
 0x12c   :  { %2226 = vmatpush3.bf16.msra.mxu1 %v2538_v63  ;;  %v2878_v6 = vpop.f32.mrb[16].mxu1  ;;  %v2573_v63 = vld [vmem:[%s3053_s4 + $0x8] sm:$0xff]  }
 0x12d   :  { %2227 = vmatprep.subr.bf16.mxu1 %v2539_v5  ;;  %v2880_v8 = vpop.f32.mrb[17].mxu1 }
 0x12e   :  { %v2882_v9 = vpop.f32.mrb[18].mxu1 }
 0x12f   :  { %v922_v10 = vpack.c.bf16 %v2882_v9, %v2878_v6  ;;  %v2886_v11 = vpop.f32.mrb[19].mxu1  ;;  %v2580_v6 = vld [vmem:[#allocation5 + $0x10] sm:$0xff]   ;;  %v2582_v9 = vld [vmem:[#allocation5 + $0x20] sm:$0xff]  }
 0x130   :  { %2228 = vmatpush3.bf16.msra.mxu1 %v2539_v5  ;;  %v921_v12 = vpack.c.bf16 %v2886_v11, %v2880_v8  ;;  %v2576_v5 = vld [vmem:[%s3053_s4 + $0x20] sm:$0xff]   ;;  %v2577_v8 = vld [vmem:[%s3053_s4 + $0x28] sm:$0xff]   ;;  %v2584_v11 = vld [vmem:[#allocation5 + $0x30] sm:$0xff]  }
 0x131   :  { %2233 = vmatprep.subr.bf16.mxu1 %v2540_v7 }
 0x133   :  { %2230 = vmatmul.mubr.bf16.vlgmr.msra.gmra.mrb[20].mxu1 %v442_v41  ;;  %v2569_v41 = vld [vmem:[#allocation2 + $0x168] sm:$0xff]  }
 0x134   :  { %2234 = vmatpush3.bf16.msra.mxu1 %v2540_v7  ;;  %2249 = vmatprep.mubr.bf16.mxu1 %v561_v52  ;;  %v2581_v7 = vld [vmem:[#allocation5 + $0x18] sm:$0xff]  }
 0x135   :  { %2235 = vmatprep.subr.bf16.mxu1 %v2541_v13 }
 0x138   :  { %2236 = vmatpush3.bf16.msra.mxu1 %v2541_v13 }
 0x139   :  { %2237 = vmatprep.subr.bf16.mxu1 %v2542_v14 }
 0x13c   :  { %2238 = vmatpush3.bf16.msra.mxu1 %v2542_v14 }
 0x13d   :  { %2239 = vmatprep.subr.bf16.mxu1 %v2543_v15 }
 0x140   :  { %2240 = vmatpush3.bf16.msra.mxu1 %v2543_v15 }
 0x141   :  { %2241 = vmatprep.subr.bf16.mxu1 %v2544_v16 }
 0x144   :  { %2242 = vmatpush3.bf16.msra.mxu1 %v2544_v16 }
 0x145   :  { %2243 = vmatprep.subr.bf16.mxu1 %v2545_v17 }
 0x148   :  { %2244 = vmatpush3.bf16.msra.mxu1 %v2545_v17 }
 0x149   :  { %2245 = vmatprep.subr.bf16.mxu1 %v2546_v18 }
 0x14c   :  { %2246 = vmatpush3.bf16.msra.mxu1 %v2546_v18  ;;  %v2586_v18 = vld [vmem:[#allocation5 + $0x40] sm:$0xff]  }
 0x14d   :  { %2247 = vmatprep.subr.bf16.mxu1 %v2547_v19 }
 0x150   :  { %2248 = vmatpush3.bf16.msra.mxu1 %v2547_v19 }
 0x151   :  { %2253 = vmatprep.subr.bf16.mxu1 %v2548_v20 }
 0x153   :  { %2250 = vmatmul.mubr.bf16.vlgmr.msra.gmra.mrb[20].mxu1 %v562_v50 }
 0x154   :  { %2254 = vmatpush3.bf16.msra.mxu1 %v2548_v20  ;;  %2269 = vmatprep.mubr.bf16.mxu1 %v681_v60  ;;  %v2587_v20 = vld [vmem:[#allocation5 + $0x48] sm:$0xff]  }
 0x155   :  { %2255 = vmatprep.subr.bf16.mxu1 %v2549_v21 }
 0x158   :  { %2256 = vmatpush3.bf16.msra.mxu1 %v2549_v21 }
 0x159   :  { %2257 = vmatprep.subr.bf16.mxu1 %v2550_v22 }
 0x15c   :  { %2258 = vmatpush3.bf16.msra.mxu1 %v2550_v22 }
 0x15d   :  { %2259 = vmatprep.subr.bf16.mxu1 %v2551_v23 }
 0x160   :  { %2260 = vmatpush3.bf16.msra.mxu1 %v2551_v23 }
 0x161   :  { %2261 = vmatprep.subr.bf16.mxu1 %v2552_v24 }
 0x164   :  { %2262 = vmatpush3.bf16.msra.mxu1 %v2552_v24  ;;  %v2588_v24 = vld [vmem:[#allocation5 + $0x50] sm:$0xff]  }
 0x165   :  { %2263 = vmatprep.subr.bf16.mxu1 %v2553_v25 }
 0x168   :  { %2264 = vmatpush3.bf16.msra.mxu1 %v2553_v25 }
 0x169   :  { %2265 = vmatprep.subr.bf16.mxu1 %v2554_v26 }
 0x16c   :  { %2266 = vmatpush3.bf16.msra.mxu1 %v2554_v26 }
 0x16d   :  { %2267 = vmatprep.subr.bf16.mxu1 %v2555_v27 }
 0x170   :  { %2268 = vmatpush3.bf16.msra.mxu1 %v2555_v27 }
 0x171   :  { %2273 = vmatprep.subr.bf16.mxu1 %v2556_v28 }
 0x173   :  { %2270 = vmatmul.mubr.bf16.vlgmr.msra.gmra.mrb[20].mxu1 %v682_v58 }
 0x174   :  { %2274 = vmatpush3.bf16.msra.mxu1 %v2556_v28  ;;  %2289 = vmatprep.mubr.bf16.mxu1 %v801_v4  ;;  %v2575_v4 = vld [vmem:[%s3053_s4 + $0x18] sm:$0xff]  }
 0x175   :  { %2275 = vmatprep.subr.bf16.mxu1 %v2557_v29  ;;  %v2589_v28 = vld [vmem:[#allocation5 + $0x58] sm:$0xff]  }
 0x178   :  { %2276 = vmatpush3.bf16.msra.mxu1 %v2557_v29 }
 0x179   :  { %2277 = vmatprep.subr.bf16.mxu1 %v2558_v30 }
 0x17c   :  { %2278 = vmatpush3.bf16.msra.mxu1 %v2558_v30 }
 0x17d   :  { %2279 = vmatprep.subr.bf16.mxu1 %v2559_v31 }
 0x180   :  { %2280 = vmatpush3.bf16.msra.mxu1 %v2559_v31 }
 0x181   :  { %2281 = vmatprep.subr.bf16.mxu1 %v2560_v32 }
 0x184   :  { %2282 = vmatpush3.bf16.msra.mxu1 %v2560_v32  ;;  %v2590_v32 = vld [vmem:[#allocation5 + $0x60] sm:$0xff]  }
 0x185   :  { %2283 = vmatprep.subr.bf16.mxu1 %v2561_v33 }
 0x188   :  { %2284 = vmatpush3.bf16.msra.mxu1 %v2561_v33 }
 0x189   :  { %2285 = vmatprep.subr.bf16.mxu1 %v2562_v34 }
 0x18c   :  { %2286 = vmatpush3.bf16.msra.mxu1 %v2562_v34 }
 0x18d   :  { %2287 = vmatprep.subr.bf16.mxu1 %v2563_v35 }
 0x190   :  { %2288 = vmatpush3.bf16.msra.mxu1 %v2563_v35 }
 0x191   :  { %2293 = vmatprep.subr.bf16.mxu1 %v2564_v36 }
 0x193   :  { %2290 = vmatmul.mubr.bf16.vlgmr.msra.gmra.mrb[20].mxu1 %v802_v2  ;;  %v2710_v2 = vmov 0.0  }
 0x194   :  { %2294 = vmatpush3.bf16.msra.mxu1 %v2564_v36  ;;  %2309 = vmatprep.mubr.bf16.mxu1 %v921_v12  ;;  %v2585_v12 = vld [vmem:[#allocation5 + $0x38] sm:$0xff]   ;;  %v2591_v36 = vld [vmem:[#allocation5 + $0x68] sm:$0xff]  }
 0x195   :  { %2295 = vmatprep.subr.bf16.mxu1 %v2565_v37 }
 0x198   :  { %2296 = vmatpush3.bf16.msra.mxu1 %v2565_v37  ;;  %v2592_v37 = vld [vmem:[#allocation5 + $0x70] sm:$0xff]  }
 0x199   :  { %2297 = vmatprep.subr.bf16.mxu1 %v2566_v38 }
 0x19c   :  { %2298 = vmatpush3.bf16.msra.mxu1 %v2566_v38  ;;  %v2593_v38 = vld [vmem:[#allocation5 + $0x78] sm:$0xff]  }
 0x19d   :  { %2299 = vmatprep.subr.bf16.mxu1 %v2567_v39 }
 0x1a0   :  { %2300 = vmatpush3.bf16.msra.mxu1 %v2567_v39  ;;  %v2594_v39 = vld [vmem:[#allocation5 + $0x80] sm:$0xff]  }
 0x1a1   :  { %2301 = vmatprep.subr.bf16.mxu1 %v2568_v40 }
 0x1a4   :  { %2302 = vmatpush3.bf16.msra.mxu1 %v2568_v40  ;;  %v2595_v40 = vld [vmem:[#allocation5 + $0x88] sm:$0xff]  }
 0x1a5   :  { %2303 = vmatprep.subr.bf16.mxu1 %v2569_v41 }
 0x1a8   :  { %2304 = vmatpush3.bf16.msra.mxu1 %v2569_v41  ;;  %v2596_v41 = vld [vmem:[#allocation5 + $0x90] sm:$0xff]  }
 0x1a9   :  { %2305 = vmatprep.subr.bf16.mxu1 %v2570_v42 }
 0x1ac   :  { %2306 = vmatpush3.bf16.msra.mxu1 %v2570_v42  ;;  %v2597_v42 = vld [vmem:[#allocation5 + $0x98] sm:$0xff]  }
 0x1ad   :  { %2307 = vmatprep.subr.bf16.mxu1 %v2571_v43 }
 0x1b0   :  { %2308 = vmatpush3.bf16.msra.mxu1 %v2571_v43  ;;  %v2598_v43 = vld [vmem:[#allocation5 + $0xa0] sm:$0xff]  }
 0x1b3   :  { %2310 = vmatmul.mubr.bf16.vlgmr.msra.gmra.mrb[20].mxu1 %v922_v10  ;;  %v2583_v10 = vld [vmem:[#allocation5 + $0x28] sm:$0xff]  }
 0x286   :  { %v2311_v47 = vpop.f32.mrb[20].mxu1 }
 0x287   :  { %v2457_v49 = vadd.f32 %v2311_v47, %v320_v45  ;;  %v1022_v50 = vpop.f32.mrb[21].mxu1  ;;  %v2600_v45 = vld [vmem:[#allocation5 + $0xb0] sm:$0xff]   ;;  %v2602_v47 = vld [vmem:[#allocation5 + $0xc0] sm:$0xff]  }
 0x288   :  { %v2458_v52 = vadd.f32 %v1022_v50, %v318_v46  ;;  %v2312_v53 = vpop.f32.mrb[22].mxu1  ;;  %v2601_v46 = vld [vmem:[#allocation5 + $0xb8] sm:$0xff]  }
 0x289   :  { %v2459_v54 = vadd.f32 %v2312_v53, %v321_v48  ;;  %v1025_v55 = vpop.f32.mrb[23].mxu1  ;;  %v1043_v57 = vmax.f32 %v2457_v49, 0.0  ;;  %v2603_v48 = vld [vmem:[#allocation5 + $0xc8] sm:$0xff]   ;;  %v2604_v49 = vld [vmem:[#allocation5 + $0xd0] sm:$0xff]   ;;  %v2605_v50 = vld [vmem:[#allocation5 + $0xd8] sm:$0xff]  }
 0x28a   :  { %v2460_v56 = vadd.f32 %v1025_v55, %v319_v51  ;;  %v1041_v59 = vmax.f32 %v2458_v52, 0.0  ;;  %v2606_v51 = vld [vmem:[#allocation5 + $0xe0] sm:$0xff]   ;;  %v2607_v52 = vld [vmem:[#allocation5 + $0xe8] sm:$0xff]   ;;  %v2608_v53 = vld [vmem:[#allocation5 + $0xf0] sm:$0xff]  }
 0x28b   :  { %v1044_v58 = vmax.f32 %v2459_v54, 0.0  ;;  %v2609_v54 = vld [vmem:[#allocation5 + $0xf8] sm:$0xff]   ;;  %v2610_v55 = vld [vmem:[#allocation5 + $0x100] sm:$0xff]  }
 0x28c   :  { %v1042_v60 = vmax.f32 %v2460_v56, 0.0  ;;  %v2611_v56 = vld [vmem:[#allocation5 + $0x108] sm:$0xff]  }
 0x28d   :  { %v1058_v61 = vpack.c.bf16 %v1044_v58, %v1043_v57  ;;  %v2612_v57 = vld [vmem:[#allocation5 + $0x110] sm:$0xff]   ;;  %v2613_v58 = vld [vmem:[#allocation5 + $0x118] sm:$0xff]  }
 0x28e   :  { %v1057_v62 = vpack.c.bf16 %v1042_v60, %v1041_v59  ;;  %v2614_v59 = vld [vmem:[#allocation5 + $0x120] sm:$0xff]   ;;  %v2615_v60 = vld [vmem:[#allocation5 + $0x128] sm:$0xff]  }
 0x290   :  { %2313 = vmatprep.subr.bf16.mxu0 %v1057_v62 }
 0x291   :  { %2314 = vmatpush3.bf16.msra.mxu0 %v1057_v62  ;;  %v2617_v62 = vld [vmem:[#allocation5 + $0x138] sm:$0xff]  }
 0x292   :  { %2315 = vmatprep.subr.bf16.mxu0 %v1058_v61 }
 0x295   :  { %2316 = vmatpush3.bf16.msra.mxu0 %v1058_v61  ;;  %v2616_v61 = vld [vmem:[#allocation5 + $0x130] sm:$0xff]  }
 0x296   :  { %2329 = vmatprep.subr.bf16.mxu0 %v2710_v2 }
 0x298   :  { %2318 = vmatmul.mubr.msk.bf16.vlgmr.msra.gmra.mrb[4].mxu0 %vm1089_vm1, %v2573_v63  ;;  %v2618_v63 = vld [vmem:[#allocation5 + $0x140] sm:$0xff]  }
 0x299   :  { %2321 = vmatprep.mubr.msk.bf16.mxu0 %vm1089_vm1, %v2574_v0  ;;  %2330 = vmatpush3.bf16.msra.mxu0 %v2578_v1  ;;  %v2619_v0 = vld [vmem:[#allocation5 + $0x148] sm:$0xff]   ;;  %v2620_v1 = vld [vmem:[#allocation5 + $0x150] sm:$0xff]  }
 0x29a   :  { %2331 = vmatprep.subr.bf16.mxu0 %v2710_v2 }
 0x29d   :  { %2332 = vmatpush3.bf16.msra.mxu0 %v2579_v3  ;;  %v2621_v3 = vld [vmem:[#allocation5 + $0x158] sm:$0xff]  }
 0x29e   :  { %2333 = vmatprep.subr.bf16.mxu0 %v2710_v2 }
 0x2a0   :  { %2322 = vmatmul.mubr.msk.bf16.gmra.mrb[8].mxu0 %vm1089_vm1, %v2575_v4  ;;  %v2622_v4 = vld [vmem:[#allocation5 + $0x160] sm:$0xff]  }
 0x2a1   :  { %2325 = vmatprep.mubr.msk.bf16.mxu0 %vm1089_vm1, %v2576_v5  ;;  %2334 = vmatpush3.bf16.msra.mxu0 %v2580_v6  ;;  %v2623_v5 = vld [vmem:[#allocation5 + $0x168] sm:$0xff]   ;;  %v2624_v6 = vld [vmem:[#allocation5 + $0x170] sm:$0xff]  }
 0x2a2   :  { %2335 = vmatprep.subr.bf16.mxu0 %v2710_v2 }
 0x2a5   :  { %2336 = vmatpush3.bf16.msra.mxu0 %v2581_v7  ;;  %v2625_v7 = vld [vmem:[#allocation5 + $0x178] sm:$0xff]  }
 0x2a6   :  { %2337 = vmatprep.subr.bf16.mxu0 %v2710_v2 }
 0x2a8   :  { %2326 = vmatmul.mubr.msk.bf16.gmra.mrb[12].mxu0 %vm1089_vm1, %v2577_v8  ;;  %v1844_v8 = vlaneseq }
 0x2a9   :  { %2338 = vmatpush3.bf16.msra.mxu0 %v2582_v9  ;;  %2345 = vmatprep.mubr.msk.bf16.mxu0 %vm2711_vm2, %v2710_v2 }
 0x2aa   :  { %2339 = vmatprep.subr.bf16.mxu0 %v2710_v2  ;;  %v1845_v9 = vand.u32 127, %v1844_v8 }
 0x2ac   :  { %vm1846_vm3 = vcmp.lt.s32.totalorder %v1845_v9, 16 }
 0x2ad   :  { %2340 = vmatpush3.bf16.msra.mxu0 %v2583_v10  ;;  %v1189_v10 = vld [vmem:[%s3055_s6] sm:$0xff] }
 0x2ae   :  { %2341 = vmatprep.subr.bf16.mxu0 %v2710_v2 }
 0x2b1   :  { %2342 = vmatpush3.bf16.msra.mxu0 %v2584_v11 }
 0x2b2   :  { %2343 = vmatprep.subr.bf16.mxu0 %v2710_v2 }
 0x2b5   :  { %2344 = vmatpush3.bf16.msra.mxu0 %v2585_v12  ;;  %v1190_v12 = vld [vmem:[%s3055_s6 + $0x8] sm:$0xff]  ;;  %s2712_s6 = smov [#allocation7]  }
 0x2b6   :  { %2349 = vmatprep.subr.bf16.mxu0 %v2710_v2  ;;  %s1878_s11 = sshll.u32 %s2712_s6, 4  ;;  %s1879_s11 = int_to_ptr.vmem [resolvable:$true] %s1878_s11 }
 0x2b7   :  { %s2678_s12 = scalar_lea.vmem %s1879_s11, 256  ;;  %p2683_p3 = scmp.lt.s32.totalorder %s1879_s11, %s1879_s11 }
 0x2b8   :  { %p2679_p2 = scmp.ne.s32.totalorder %s1879_s11, %s2678_s12  ;;  %p2684_p4 = scmp.lt.s32.totalorder %s2678_s12, %s2678_s12 }
 0x2ba   :  { %p2685_p5 = por %p2684_p4, %p2683_p3 }
 0x2bc   :  { %p2686_p6 = pnand %p2685_p5, %p2679_p2 }
 0x36b   :  { %v2319_v13 = vpop.f32.mrb[4].mxu0 }
 0x36c   :  { %v1142_v14 = vpop.f32.mrb[5].mxu0 }
 0x36d   :  { %v2320_v15 = vpop.f32.mrb[6].mxu0 }
 0x36e   :  { %v1299_v16 = vpack.c.bf16 %v2320_v15, %v2319_v13  ;;  %v1145_v17 = vpop.f32.mrb[7].mxu0 }
 0x36f   :  { %v1191_v19 = vpack.c.bf16 %v1145_v17, %v1142_v14 }
 0x371   :  { %2346 = vmatmul.mubr.bf16.vlgmr.msra.gmra.mrb[16].mxu0 %v1191_v19 }
 0x372   :  { %2350 = vmatpush3.bf16.msra.mxu0 %v2586_v18  ;;  %2365 = vmatprep.mubr.msk.bf16.mxu0 %vm2711_vm2, %v2710_v2 }
 0x373   :  { %2351 = vmatprep.subr.bf16.mxu0 %v2710_v2  ;;  %v2958_v21 = vpop.f32.mrb[8].mxu0 }
 0x374   :  { %v1158_v22 = vpop.f32.mrb[9].mxu0 }
 0x375   :  { %v2960_v23 = vpop.f32.mrb[10].mxu0 }
 0x376   :  { %2352 = vmatpush3.bf16.msra.mxu0 %v2587_v20  ;;  %v1517_v25 = vpack.c.bf16 %v2960_v23, %v2958_v21  ;;  %v1161_v26 = vpop.f32.mrb[11].mxu0 }
 0x377   :  { %2353 = vmatprep.subr.bf16.mxu0 %v2710_v2  ;;  %v1408_v27 = vpack.c.bf16 %v1161_v26, %v1158_v22 }
 0x37a   :  { %2354 = vmatpush3.bf16.msra.mxu0 %v2588_v24 }
 0x37b   :  { %2355 = vmatprep.subr.bf16.mxu0 %v2710_v2  ;;  %v2966_v29 = vpop.f32.mrb[12].mxu0 }
 0x37c   :  { %v2968_v30 = vpop.f32.mrb[13].mxu0 }
 0x37d   :  { %v2970_v31 = vpop.f32.mrb[14].mxu0 }
 0x37e   :  { %2356 = vmatpush3.bf16.msra.mxu0 %v2589_v28  ;;  %v1735_v33 = vpack.c.bf16 %v2970_v31, %v2966_v29  ;;  %v2974_v34 = vpop.f32.mrb[15].mxu0 }
 0x37f   :  { %2357 = vmatprep.subr.bf16.mxu0 %v2710_v2  ;;  %v1626_v35 = vpack.c.bf16 %v2974_v34, %v2968_v30 }
 0x382   :  { %2358 = vmatpush3.bf16.msra.mxu0 %v2590_v32 }
 0x383   :  { %2359 = vmatprep.subr.bf16.mxu0 %v2710_v2 }
 0x386   :  { %2360 = vmatpush3.bf16.msra.mxu0 %v2591_v36 }
 0x387   :  { %2361 = vmatprep.subr.bf16.mxu0 %v2710_v2 }
 0x38a   :  { %2362 = vmatpush3.bf16.msra.mxu0 %v2592_v37 }
 0x38b   :  { %2363 = vmatprep.subr.bf16.mxu0 %v2710_v2 }
 0x38e   :  { %2364 = vmatpush3.bf16.msra.mxu0 %v2593_v38 }
 0x38f   :  { %2369 = vmatprep.subr.bf16.mxu0 %v2710_v2 }
 0x391   :  { %2366 = vmatmul.mubr.bf16.vlgmr.msra.gmra.mrb[16].mxu0 %v1299_v16 }
 0x392   :  { %2370 = vmatpush3.bf16.msra.mxu0 %v2594_v39  ;;  %2385 = vmatprep.mubr.msk.bf16.mxu0 %vm2711_vm2, %v2710_v2 }
 0x393   :  { %2371 = vmatprep.subr.bf16.mxu0 %v2710_v2 }
 0x396   :  { %2372 = vmatpush3.bf16.msra.mxu0 %v2595_v40 }
 0x397   :  { %2373 = vmatprep.subr.bf16.mxu0 %v2710_v2 }
 0x39a   :  { %2374 = vmatpush3.bf16.msra.mxu0 %v2596_v41 }
 0x39b   :  { %2375 = vmatprep.subr.bf16.mxu0 %v2710_v2 }
 0x39e   :  { %2376 = vmatpush3.bf16.msra.mxu0 %v2597_v42 }
 0x39f   :  { %2377 = vmatprep.subr.bf16.mxu0 %v2710_v2 }
 0x3a2   :  { %2378 = vmatpush3.bf16.msra.mxu0 %v2598_v43 }
 0x3a3   :  { %2379 = vmatprep.subr.bf16.mxu0 %v2710_v2 }
 0x3a6   :  { %2380 = vmatpush3.bf16.msra.mxu0 %v2599_v44 }
 0x3a7   :  { %2381 = vmatprep.subr.bf16.mxu0 %v2710_v2 }
 0x3aa   :  { %2382 = vmatpush3.bf16.msra.mxu0 %v2600_v45 }
 0x3ab   :  { %2383 = vmatprep.subr.bf16.mxu0 %v2710_v2 }
 0x3ae   :  { %2384 = vmatpush3.bf16.msra.mxu0 %v2601_v46 }
 0x3af   :  { %2389 = vmatprep.subr.bf16.mxu0 %v2710_v2 }
 0x3b1   :  { %2386 = vmatmul.mubr.bf16.vlgmr.msra.gmra.mrb[16].mxu0 %v1408_v27 }
 0x3b2   :  { %2390 = vmatpush3.bf16.msra.mxu0 %v2602_v47  ;;  %2405 = vmatprep.mubr.msk.bf16.mxu0 %vm2711_vm2, %v2710_v2 }
 0x3b3   :  { %2391 = vmatprep.subr.bf16.mxu0 %v2710_v2 }
 0x3b6   :  { %2392 = vmatpush3.bf16.msra.mxu0 %v2603_v48 }
 0x3b7   :  { %2393 = vmatprep.subr.bf16.mxu0 %v2710_v2 }
 0x3ba   :  { %2394 = vmatpush3.bf16.msra.mxu0 %v2604_v49 }
 0x3bb   :  { %2395 = vmatprep.subr.bf16.mxu0 %v2710_v2 }
 0x3be   :  { %2396 = vmatpush3.bf16.msra.mxu0 %v2605_v50 }
 0x3bf   :  { %2397 = vmatprep.subr.bf16.mxu0 %v2710_v2 }
 0x3c2   :  { %2398 = vmatpush3.bf16.msra.mxu0 %v2606_v51 }
 0x3c3   :  { %2399 = vmatprep.subr.bf16.mxu0 %v2710_v2 }
 0x3c6   :  { %2400 = vmatpush3.bf16.msra.mxu0 %v2607_v52 }
 0x3c7   :  { %2401 = vmatprep.subr.bf16.mxu0 %v2710_v2 }
 0x3ca   :  { %2402 = vmatpush3.bf16.msra.mxu0 %v2608_v53 }
 0x3cb   :  { %2403 = vmatprep.subr.bf16.mxu0 %v2710_v2 }
 0x3ce   :  { %2404 = vmatpush3.bf16.msra.mxu0 %v2609_v54 }
 0x3cf   :  { %2409 = vmatprep.subr.bf16.mxu0 %v2710_v2 }
 0x3d1   :  { %2406 = vmatmul.mubr.bf16.vlgmr.msra.gmra.mrb[16].mxu0 %v1517_v25 }
 0x3d2   :  { %2410 = vmatpush3.bf16.msra.mxu0 %v2610_v55  ;;  %2425 = vmatprep.mubr.msk.bf16.mxu0 %vm2711_vm2, %v2710_v2 }
 0x3d3   :  { %2411 = vmatprep.subr.bf16.mxu0 %v2710_v2 }
 0x3d6   :  { %2412 = vmatpush3.bf16.msra.mxu0 %v2611_v56 }
 0x3d7   :  { %2413 = vmatprep.subr.bf16.mxu0 %v2710_v2 }
 0x3da   :  { %2414 = vmatpush3.bf16.msra.mxu0 %v2612_v57 }
 0x3db   :  { %2415 = vmatprep.subr.bf16.mxu0 %v2710_v2 }
 0x3de   :  { %2416 = vmatpush3.bf16.msra.mxu0 %v2613_v58 }
 0x3df   :  { %2417 = vmatprep.subr.bf16.mxu0 %v2710_v2 }
 0x3e2   :  { %2418 = vmatpush3.bf16.msra.mxu0 %v2614_v59 }
 0x3e3   :  { %2419 = vmatprep.subr.bf16.mxu0 %v2710_v2 }
 0x3e6   :  { %2420 = vmatpush3.bf16.msra.mxu0 %v2615_v60 }
 0x3e7   :  { %2421 = vmatprep.subr.bf16.mxu0 %v2710_v2 }
 0x3ea   :  { %2422 = vmatpush3.bf16.msra.mxu0 %v2616_v61 }
 0x3eb   :  { %2423 = vmatprep.subr.bf16.mxu0 %v2710_v2 }
 0x3ee   :  { %2424 = vmatpush3.bf16.msra.mxu0 %v2617_v62 }
 0x3ef   :  { %2429 = vmatprep.subr.bf16.mxu0 %v2710_v2 }
 0x3f1   :  { %2426 = vmatmul.mubr.bf16.vlgmr.msra.gmra.mrb[16].mxu0 %v1626_v35 }
 0x3f2   :  { %2430 = vmatpush3.bf16.msra.mxu0 %v2618_v63  ;;  %2445 = vmatprep.mubr.msk.bf16.mxu0 %vm2711_vm2, %v2710_v2 }
 0x3f3   :  { %2431 = vmatprep.subr.bf16.mxu0 %v2710_v2 }
 0x3f6   :  { %2432 = vmatpush3.bf16.msra.mxu0 %v2619_v0 }
 0x3f7   :  { %2433 = vmatprep.subr.bf16.mxu0 %v2710_v2 }
 0x3fa   :  { %2434 = vmatpush3.bf16.msra.mxu0 %v2620_v1 }
 0x3fb   :  { %2435 = vmatprep.subr.bf16.mxu0 %v2710_v2 }
 0x3fe   :  { %2436 = vmatpush3.bf16.msra.mxu0 %v2621_v3 }
 0x3ff   :  { %2437 = vmatprep.subr.bf16.mxu0 %v2710_v2 }
 0x402   :  { %2438 = vmatpush3.bf16.msra.mxu0 %v2622_v4 }
 0x403   :  { %2439 = vmatprep.subr.bf16.mxu0 %v2710_v2 }
 0x406   :  { %2440 = vmatpush3.bf16.msra.mxu0 %v2623_v5 }
 0x407   :  { %2441 = vmatprep.subr.bf16.mxu0 %v2710_v2 }
 0x40a   :  { %2442 = vmatpush3.bf16.msra.mxu0 %v2624_v6 }
 0x40b   :  { %2443 = vmatprep.subr.bf16.mxu0 %v2710_v2 }
 0x40e   :  { %2444 = vmatpush3.bf16.msra.mxu0 %v2625_v7 }
 0x411   :  { %2446 = vmatmul.mubr.bf16.vlgmr.msra.gmra.mrb[16].mxu0 %v1735_v33 }
 0x4e4   :  { %v1835_v11 = vpop.f32.mrb[16].mxu0 }
 0x4e5   :  { %v2461_v13 = vadd.f32 %v1835_v11, %v1189_v10  ;;  %v2447_v14 = vpop.f32.mrb[17].mxu0 }
 0x4e6   :  { %v1838_v2 = vpop.f32.mrb[18].mxu0 }
 0x4e7   :  { %v2462_v15 = vadd.f32 %v1838_v2, %v1190_v12  ;;  %v2448_v16 = vpop.f32.mrb[19].mxu0  ;;  %v1847_v17 = vsel %vm1846_vm3, %v2461_v13, -1e+30 }
 0x4e8   :  { %1849 = vmax.xlane.f32.xlu0 %v1847_v17 }
 0x4e9   :  { %v1848_v18 = vsel %vm1846_vm3, %v2462_v15, -1e+30 }
 0x4ec   :  { %1851 = vmax.xlane.f32.xlu0 %v1848_v18 }
 0x575   :  { %v1850_v19 = vpop.xlane.xlu0 %1849 }
 0x576   :  { %v1853_v20 = vsub.f32 %v1847_v17, %v1850_v19  ;;  %v1863_v30 = vsub.f32 %v2461_v13, %v1850_v19 }
 0x578   :  { %v1855_v21 = vmul.f32 1.442695, %v1853_v20 }
 0x579   :  { %v1852_v22 = vpop.xlane.xlu0 %1851 }
 0x57a   :  { %v1854_v23 = vsub.f32 %v1848_v18, %v1852_v22  ;;  %2626 = vpow2.f32 %v1855_v21  ;;  %v1864_v34 = vsub.f32 %v2462_v15, %v1852_v22 }
 0x57c   :  { %v1857_v24 = vmul.f32 1.442695, %v1854_v23 }
 0x57e   :  { %2628 = vpow2.f32 %v1857_v24 }
 0x584   :  { %v2627_v25 = vpop.eup %2626 }
 0x585   :  { %1859 = vadd.xlane.f32.xlu1 %v2627_v25 }
 0x588   :  { %v2629_v26 = vpop.eup %2628 }
 0x589   :  { %1861 = vadd.xlane.f32.xlu1 %v2629_v26 }
 0x612   :  { %v1860_v27 = vpop.xlane.xlu1 %1859 }
 0x613   :  { %2630 = vlog2.f32 %v1860_v27 }
 0x616   :  { %v1862_v28 = vpop.xlane.xlu1 %1861 }
 0x617   :  { %2632 = vlog2.f32 %v1862_v28 }
 0x61d   :  { %v2631_v29 = vpop.eup %2630 }
 0x61e   :  { %v1866_v31 = vmul.f32 0.6931472, %v2631_v29 }
 0x620   :  { %v1869_v32 = vsub.f32 %v1863_v30, %v1866_v31 }
 0x621   :  { %v2633_v33 = vpop.eup %2632 }
 0x622   :  { %1871 = vst [vmem:[#allocation7] sm:$0xff] %v1869_v32  ;;  %v1868_v35 = vmul.f32 0.6931472, %v2633_v33 }
 0x624   :  { %v1870_v36 = vsub.f32 %v1864_v34, %v1868_v35 }
 0x626   :  { %1872 = vst [vmem:[#allocation7 + $0x8] sm:$0xff] %v1870_v36 }
 0x627   :  { %2689 = shalt.err (!%p2686_p6)
}
 0x628   :  { %s2690_s15 = scalar_lea.hbm %s3056_s7, 256 }
 0x629   :  { %p2691_p7 = scmp.ne.s32.totalorder %s3056_s7, %s2690_s15  ;;  %p2694_p8 = scmp.lt.u32.totalorder %s2690_s15, %s3056_s7 }
 0x62b   :  { %p2696_p9 = pnand %p2694_p8, %p2691_p7 }
 0x62d   :  { %2699 = shalt.err (!%p2696_p9)
}
 0x62e   :  { %s2713_s19 = smov 128   ;;  %s2714_s20 = smov 8  }
 0x62f   :  { %1884 = dma.vmem_to_hbm [thread:$0]  %s1879_s11, 256, %s3056_s7, [#allocation4], %s2713_s19, %s2713_s19, %s2714_s20  }
 0x630   :  { %2704 = dma.done.wait [#allocation4], 256  }
 0x631   :  { %2705 = vsyncadd [#allocation4], 4294967040 }
 0x632   :  { %1888 = vsyncpa [#allocation3], 1 }
 0x633   :  { %1889 = vsyncpa [#allocation6], 1 }
 0x634   :  { %1890 = vsyncpa [#allocation4], 1 }

</bundles_post_ra>
